<compile_context>
chip_gen: v7x
topology: tpu7x:2x2x1
jax: 0.10.0
libtpu: 0.0.40
codegen_flags: <defaults>
</compile_context>

<pallas_src>
import functools

import jax
import jax.numpy as jnp
from jax.experimental import pallas as pl
from jax.experimental.pallas import tpu as pltpu


def _round_up(a, m):
    return -(-a // m) * m


def _residual_block_kernel(*refs, K, dilation, pad, PADU, TL, C_out, Cp, use_1x1):
    """One (batch, time-tile) step: conv1+ReLU -> conv2+ReLU -> residual add.

    Layout: channels on sublanes, time on lanes.
      x_ref    : (C_in,  TL)        bf16   current time tile of the input
      w1c_ref  : (M1,    C_in)      bf16   conv_1 last tap (+ stacked 1x1 residual)
      b1_ref   : (Cp, 1)            f32
      w2c_ref  : (Cp, Cp)           bf16   conv_2 last tap
      b2_ref   : (Cp, 1)            f32
      w1h_ref  : ((K-1)*Cp, C_in)   bf16   conv_1 halo taps 0..K-2   (only K > 1)
      w2h_ref  : ((K-1)*Cp, Cp)     bf16   conv_2 halo taps 0..K-2   (only K > 1)
      bres_ref : (Cp, 1)            f32    (only use_1x1)
      o_ref    : (C_out, TL)        out dtype
      xext_ref : (C_in, PADU+TL)    bf16   [unused | carried halo | current x]
      hext_ref : (Cp,   PADU+TL)    bf16   [unused | carried halo | conv1 act]
    """
    it = iter(refs)
    x_ref = next(it)
    w1c_ref = next(it)
    b1_ref = next(it)
    w2c_ref = next(it)
    b2_ref = next(it)
    w1h_ref = next(it) if K > 1 else None
    w2h_ref = next(it) if K > 1 else None
    bres_ref = next(it) if use_1x1 else None
    o_ref = next(it)
    if pad > 0:
        xext_ref = next(it)
        hext_ref = next(it)

    j = pl.program_id(1)
    x_tile = x_ref[...]                       # (C_in, TL) bf16

    if pad > 0:                               # static guard (K == 1 has no halo)
        # Zero the causal left context once per batch element; the zeroing store
        # covers the whole lane-aligned [0, PADU) slab.  Later tiles carry the
        # halo in VMEM, so no left-padded copy of x ever exists in HBM.
        @pl.when(j == 0)
        def _():
            xext_ref[:, 0:PADU] = jnp.zeros((xext_ref.shape[0], PADU), xext_ref.dtype)
            hext_ref[:, 0:PADU] = jnp.zeros((hext_ref.shape[0], PADU), hext_ref.dtype)

        # Lane-aligned big store (PADU and TL are multiples of 128).
        xext_ref[:, PADU:PADU + TL] = x_tile

    # ---- conv_1 (dilated, causal): K accumulated matmuls.  The last tap is
    #      fused with the 1x1 residual projection (rows [Cp:2Cp) of w1c). ------
    cur1 = jnp.dot(w1c_ref[...], x_tile, preferred_element_type=jnp.float32)  # (M1, TL)
    acc1 = cur1[0:Cp, :]
    for t in range(K - 1):
        off = PADU - pad + t * dilation
        acc1 = acc1 + jnp.dot(w1h_ref[t * Cp:(t + 1) * Cp, :],
                              xext_ref[:, off:off + TL],
                              preferred_element_type=jnp.float32)
    h = jnp.maximum(acc1 + b1_ref[...], 0.0)          # (Cp, TL) f32
    # TODO(synk): dropout_1 / dropout_2 are identity here (eval-mode dropout).
    h_bf = h.astype(jnp.bfloat16)

    # ---- conv_2 (dilated, causal) + ReLU ------------------------------------
    if pad > 0:
        hext_ref[:, PADU:PADU + TL] = h_bf            # lane-aligned big store
    acc2 = jnp.dot(w2c_ref[...], h_bf, preferred_element_type=jnp.float32)
    for t in range(K - 1):
        off = PADU - pad + t * dilation
        acc2 = acc2 + jnp.dot(w2h_ref[t * Cp:(t + 1) * Cp, :],
                              hext_ref[:, off:off + TL],
                              preferred_element_type=jnp.float32)
    h2 = jnp.maximum(acc2 + b2_ref[...], 0.0)         # (Cp, TL) f32

    # ---- residual add (1x1 result already lives in cur1 when present) -------
    if use_1x1:
        res = cur1[Cp:2 * Cp, :] + bres_ref[...]      # (Cp, TL) f32
        o_ref[...] = (h2 + res)[0:C_out, :].astype(o_ref.dtype)
    else:
        o_ref[...] = (h2[0:C_out, :] + x_tile.astype(jnp.float32)).astype(o_ref.dtype)

    # ---- carry the causal halo for the next time tile (pad columns, cheap) ---
    if pad > 0:
        xext_ref[:, PADU - pad:PADU] = x_tile[:, TL - pad:TL]
        hext_ref[:, PADU - pad:PADU] = h_bf[:, TL - pad:TL]


def residual_block_forward(x, params, *, kernel_size, dilation, time_tile=2048,
                           out_dtype=jnp.float32):
    """x: (N, C_in, L) float32 (PyTorch NCW). Returns (N, C_out, L) `out_dtype`."""
    N, C_in, L = x.shape
    K = kernel_size
    pad = dilation * (K - 1)
    PADU = _round_up(pad, 128) if pad > 0 else 0

    w1, b1 = params["w1"], params["b1"]      # (C_out, C_in, K), (C_out,)
    w2, b2 = params["w2"], params["b2"]      # (C_out, C_out, K), (C_out,)
    C_out = w1.shape[0]
    use_1x1 = "w_res" in params
    if not use_1x1:
        assert C_in == C_out, "identity residual requires in_channels == out_channels"

    Cp = _round_up(C_out, 16)                # bf16 sublane packing for weights/intermediates
    M1 = 2 * Cp if use_1x1 else Cp           # conv_1 current-tap M dim (residual folded)

    # ---- time tiling & VMEM budget ------------------------------------------
    assert time_tile % 128 == 0, "time_tile must be a multiple of 128"
    min_tl = max(128, _round_up(pad, 128))   # tile must cover the causal halo
    if L <= time_tile:
        TL = max(min_tl, _round_up(L, 128))  # pad short L to 128 -> dense lane stores
    else:
        TL = max(min_tl, time_tile)

    try:
        vmem_cap = int(pltpu.get_tpu_info().vmem_capacity_bytes)
    except Exception:                        # conservative (v7x-sized) fallback
        vmem_cap = 64 * 1024 * 1024
    if vmem_cap <= 64 * 1024 * 1024:         # v7x-class part: cap the time tile
        TL = max(min_tl, min(TL, 1024))
    budget = vmem_cap // 2

    out_bytes = jnp.dtype(out_dtype).itemsize

    def vmem_est(tl):
        return (2 * C_in * tl * 2                                   # x tile, 2x buffered
                + 2 * C_out * tl * out_bytes                        # out tile, 2x buffered
                + (C_in + Cp) * (PADU + tl) * 2                     # carried-halo scratch
                + 2 * (M1 * C_in + (K - 1) * Cp * (C_in + Cp) + Cp * Cp) * 2
                + 3 * Cp * 4                                        # weights / biases
                + (M1 + 4 * Cp + C_in) * tl * 4)                    # live f32 intermediates

    while TL > min_tl and 2 * vmem_est(TL) > budget:
        TL = max(min_tl, TL - 128)
    assert TL >= pad, "time tile must cover the causal halo dilation*(kernel_size-1)"

    Lp = _round_up(L, TL)
    nT = Lp // TL
    vmem_limit = int(min(budget, max(2 * vmem_est(TL), 32 * 1024 * 1024)))

    x_in = x if Lp == L else jnp.pad(x, ((0, 0), (0, 0), (0, Lp - L)))
    x_bf = x_in.astype(jnp.bfloat16)         # bf16 MXU inputs, f32 accumulation

    # ---- weight packaging: tap-major, channel-padded, bf16 -------------------
    w1t = jnp.pad(jnp.transpose(w1, (2, 0, 1)), ((0, 0), (0, Cp - C_out), (0, 0)))
    w2t = jnp.pad(jnp.transpose(w2, (2, 0, 1)),
                  ((0, 0), (0, Cp - C_out), (0, Cp - C_out)))

    w1c = w1t[K - 1]                                             # (Cp, C_in)
    if use_1x1:
        wres = jnp.pad(params["w_res"][:, :, 0], ((0, Cp - C_out), (0, 0)))
        w1c = jnp.concatenate([w1c, wres], axis=0)               # (2*Cp, C_in)
    w1c = w1c.astype(jnp.bfloat16)
    w2c = w2t[K - 1].astype(jnp.bfloat16)                        # (Cp, Cp)

    b1c = jnp.pad(b1, (0, Cp - C_out)).reshape(Cp, 1).astype(jnp.float32)
    b2c = jnp.pad(b2, (0, Cp - C_out)).reshape(Cp, 1).astype(jnp.float32)

    inputs = [x_bf, w1c, b1c, w2c, b2c]
    in_specs = [
        pl.BlockSpec((None, C_in, TL), lambda n, j: (n, 0, j)),
        pl.BlockSpec((M1, C_in), lambda n, j: (0, 0)),
        pl.BlockSpec((Cp, 1), lambda n, j: (0, 0)),
        pl.BlockSpec((Cp, Cp), lambda n, j: (0, 0)),
        pl.BlockSpec((Cp, 1), lambda n, j: (0, 0)),
    ]
    if K > 1:
        w1h = w1t[:K - 1].reshape((K - 1) * Cp, C_in).astype(jnp.bfloat16)
        w2h = w2t[:K - 1].reshape((K - 1) * Cp, Cp).astype(jnp.bfloat16)
        inputs += [w1h, w2h]
        in_specs += [pl.BlockSpec(((K - 1) * Cp, C_in), lambda n, j: (0, 0)),
                     pl.BlockSpec(((K - 1) * Cp, Cp), lambda n, j: (0, 0))]
    if use_1x1:
        bres = jnp.pad(params["b_res"], (0, Cp - C_out)).reshape(Cp, 1).astype(jnp.float32)
        inputs += [bres]
        in_specs += [pl.BlockSpec((Cp, 1), lambda n, j: (0, 0))]

    scratch_shapes = []
    if pad > 0:
        scratch_shapes = [pltpu.VMEM((C_in, PADU + TL), jnp.bfloat16),
                          pltpu.VMEM((Cp, PADU + TL), jnp.bfloat16)]

    kernel = functools.partial(_residual_block_kernel, K=K, dilation=dilation,
                               pad=pad, PADU=PADU, TL=TL, C_out=C_out, Cp=Cp,
                               use_1x1=use_1x1)

    out = pl.pallas_call(
        kernel,
        out_shape=jax.ShapeDtypeStruct((N, C_out, Lp), out_dtype),
        grid_spec=pltpu.PrefetchScalarGridSpec(
            num_scalar_prefetch=0,
            grid=(N, nT),
            in_specs=in_specs,
            out_specs=pl.BlockSpec((None, C_out, TL), lambda n, j: (n, 0, j)),
            scratch_shapes=scratch_shapes,
        ),
        compiler_params=pltpu.CompilerParams(
            # Batch is 'parallel' (megacore shards whole batch elements, each
            # with its own private halo scratch); time is 'arbitrary' (the halo
            # is carried sequentially).
            dimension_semantics=("parallel", "arbitrary"),
            vmem_limit_bytes=vmem_limit),
    )(*inputs)

    return out if Lp == L else out[:, :, :L]


def init_params(key, in_channels, out_channels, kernel_size):
    """Deterministic synthetic params mimicking weight_norm(Conv1d) parametrization."""
    ks = jax.random.split(key, 10)

    def wn_weight(kv, kg, shape):
        v = 0.01 * jax.random.normal(kv, shape, jnp.float32)
        g = 1.0 + 0.1 * jax.random.normal(kg, (shape[0], 1, 1), jnp.float32)
        norm = jnp.sqrt(jnp.sum(v * v, axis=(1, 2), keepdims=True))
        return g * v / norm                       # w = g * v / ||v||  (per out-channel)

    params = {
        "w1": wn_weight(ks[0], ks[1], (out_channels, in_channels, kernel_size)),
        "b1": 0.1 * jax.random.normal(ks[2], (out_channels,), jnp.float32),
        "w2": wn_weight(ks[3], ks[4], (out_channels, out_channels, kernel_size)),
        "b2": 0.1 * jax.random.normal(ks[5], (out_channels,), jnp.float32),
    }
    if in_channels != out_channels:
        params["w_res"] = 0.01 * jax.random.normal(
            ks[6], (out_channels, in_channels, 1), jnp.float32)
        params["b_res"] = 0.1 * jax.random.normal(ks[7], (out_channels,), jnp.float32)
    return params


# ----------------------------- references -----------------------------------
def _causal_conv(inp, w, b, dilation):
    pad = dilation * (w.shape[-1] - 1)
    inp_p = jnp.pad(inp, ((0, 0), (0, 0), (pad, 0)))
    y = jax.lax.conv_general_dilated(
        inp_p, w, window_strides=(1,), padding="VALID",
        rhs_dilation=(dilation,), dimension_numbers=("NCH", "OIH", "NCH"),
        precision=jax.lax.Precision.HIGHEST)
    return y + b[None, :, None]


def reference_forward_f32(x, params, dilation):
    """Pure-f32 JAX reference mirroring the PyTorch forward (dropout = eval)."""
    h = jnp.maximum(_causal_conv(x, params["w1"], params["b1"], dilation), 0.0)
    h = jnp.maximum(_causal_conv(h, params["w2"], params["b2"], dilation), 0.0)
    if "w_res" in params:
        res = jax.lax.conv_general_dilated(
            x, params["w_res"], window_strides=(1,), padding="VALID",
            dimension_numbers=("NCH", "OIH", "NCH"),
            precision=jax.lax.Precision.HIGHEST) + params["b_res"][None, :, None]
    else:
        res = x
    return res + h


def reference_forward_bf16(x, params, dilation):
    """Same math with matmul operands rounded to bf16 and f32 accumulation —
    the numerics of the Pallas kernel (modulo summation order)."""
    q = lambda a: a.astype(jnp.bfloat16).astype(jnp.float32)
    h = jnp.maximum(_causal_conv(q(x), q(params["w1"]), params["b1"], dilation), 0.0)
    h = jnp.maximum(_causal_conv(q(h), q(params["w2"]), params["b2"], dilation), 0.0)
    if "w_res" in params:
        res = jax.lax.conv_general_dilated(
            q(x), q(params["w_res"]), window_strides=(1,), padding="VALID",
            dimension_numbers=("NCH", "OIH", "NCH"),
            precision=jax.lax.Precision.HIGHEST) + params["b_res"][None, :, None]
    else:
        res = q(x)
    return res + h


if __name__ == "__main__":
    key = jax.random.PRNGKey(0)

    def run_case(name, N, C_in, C_out, L, K, dilation, time_tile, case_key,
                 out_dtype=jnp.float32):
        k_x, k_p = jax.random.split(case_key)
        x = jax.random.normal(k_x, (N, C_in, L), jnp.float32)
        params = init_params(k_p, C_in, C_out, K)

        out = residual_block_forward(x, params, kernel_size=K, dilation=dilation,
                                     time_tile=time_tile, out_dtype=out_dtype)
        out = jax.block_until_ready(out)
        assert out.shape == (N, C_out, L), (name, out.shape)
        assert out.dtype == out_dtype, (name, out.dtype)
        out_f = out.astype(jnp.float32)

        ref_q = reference_forward_bf16(x, params, dilation)   # kernel-matching numerics
        ref_f = reference_forward_f32(x, params, dilation)    # full-f32 module semantics
        tol = 5e-3 if out_dtype == jnp.float32 else 5e-2
        assert jnp.allclose(out_f, ref_q, atol=tol, rtol=tol), \
            (name, float(jnp.max(jnp.abs(out_f - ref_q))))
        # loose check vs. f32 (slack only covers bf16 operand rounding)
        assert jnp.allclose(out_f, ref_f, atol=2e-1, rtol=2e-1), \
            (name, float(jnp.max(jnp.abs(out_f - ref_f))))

    k1, k2, k3 = jax.random.split(key, 3)
    # 1x1-residual path, single time tile (the module's toy config)
    run_case("small_1x1", N=2, C_in=4, C_out=8, L=16, K=3, dilation=2,
             time_tile=512, case_key=k1)
    # identity-residual path, multi-tile time axis exercising the carried halo
    run_case("multi_tile_identity", N=2, C_in=8, C_out=8, L=256, K=3, dilation=2,
             time_tile=128, case_key=k2)
    # bf16-output mode, multi-tile, 1x1-residual fold, larger dilation
    run_case("bf16_out_1x1", N=1, C_in=4, C_out=8, L=192, K=3, dilation=4,
             time_tile=128, case_key=k3, out_dtype=jnp.bfloat16)

    print("KERNEL_OK")
</pallas_src>

<mosaic_0001>
module attributes {stable_mosaic.version = 11 : i64} {
  func.func @_residual_block_kernel(%arg0: i32, %arg1: i32, %arg2: memref<1x4x128xbf16, #tpu.memory_space<vmem>>, %arg3: memref<32x4xbf16, #tpu.memory_space<vmem>>, %arg4: memref<16x1xf32, #tpu.memory_space<vmem>>, %arg5: memref<16x16xbf16, #tpu.memory_space<vmem>>, %arg6: memref<16x1xf32, #tpu.memory_space<vmem>>, %arg7: memref<32x4xbf16, #tpu.memory_space<vmem>>, %arg8: memref<32x16xbf16, #tpu.memory_space<vmem>>, %arg9: memref<16x1xf32, #tpu.memory_space<vmem>>, %arg10: memref<1x8x128xf32, #tpu.memory_space<vmem>>, %arg11: memref<4x256xbf16, #tpu.memory_space<vmem>>, %arg12: memref<16x256xbf16, #tpu.memory_space<vmem>>) attributes {dimension_semantics = [#tpu.dimension_semantics<parallel>, #tpu.dimension_semantics<arbitrary>], iteration_bounds = array<i64: 2, 1>, scalar_prefetch = 0 : i64, scratch_operands = 2 : i64, tpu.core_type = #tpu.core_type<tc>, window_params = [{transform_indices = @transform_0, window_bounds = array<i64: 1, 4, 128>}, {pipeline_mode = #tpu.pipeline_mode<synchronous>, transform_indices = @transform_1, window_bounds = array<i64: 32, 4>}, {pipeline_mode = #tpu.pipeline_mode<synchronous>, transform_indices = @transform_2, window_bounds = array<i64: 16, 1>}, {pipeline_mode = #tpu.pipeline_mode<synchronous>, transform_indices = @transform_3, window_bounds = array<i64: 16, 16>}, {pipeline_mode = #tpu.pipeline_mode<synchronous>, transform_indices = @transform_4, window_bounds = array<i64: 16, 1>}, {pipeline_mode = #tpu.pipeline_mode<synchronous>, transform_indices = @transform_5, window_bounds = array<i64: 32, 4>}, {pipeline_mode = #tpu.pipeline_mode<synchronous>, transform_indices = @transform_6, window_bounds = array<i64: 32, 16>}, {pipeline_mode = #tpu.pipeline_mode<synchronous>, transform_indices = @transform_7, window_bounds = array<i64: 16, 1>}, {transform_indices = @transform_8, window_bounds = array<i64: 1, 8, 128>}]} {
    %c0 = arith.constant 0 : index
    %c0_0 = arith.constant 0 : index
    %c0_1 = arith.constant 0 : index
    %0 = vector.load %arg2[%c0, %c0_0, %c0_1] : memref<1x4x128xbf16, #tpu.memory_space<vmem>>, vector<1x4x128xbf16>
    %1 = vector.shape_cast %0 : vector<1x4x128xbf16> to vector<4x128xbf16>
    %c0_i32 = arith.constant 0 : i32
    %2 = arith.cmpi eq, %arg1, %c0_i32 : i32
    %3 = arith.extui %2 : i1 to i32
    %c0_i32_2 = arith.constant 0 : i32
    %4 = arith.cmpi ne, %3, %c0_i32_2 : i32
    scf.if %4 {
      %cst_43 = arith.constant 0.000000e+00 : bf16
      %52 = vector.broadcast %cst_43 : bf16 to vector<4x128xbf16>
      %c0_44 = arith.constant 0 : index
      %c0_45 = arith.constant 0 : index
      %53 = vector.load %arg11[%c0_44, %c0_45] : memref<4x256xbf16, #tpu.memory_space<vmem>>, vector<4x128xbf16>
      tpu.vector_store %arg11[%c0_44, %c0_45], %52 {strides = array<i32>} : memref<4x256xbf16, #tpu.memory_space<vmem>>, vector<4x128xbf16>,
      %cst_46 = arith.constant 0.000000e+00 : bf16
      %54 = vector.broadcast %cst_46 : bf16 to vector<16x128xbf16>
      %c0_47 = arith.constant 0 : index
      %c0_48 = arith.constant 0 : index
      %55 = vector.load %arg12[%c0_47, %c0_48] : memref<16x256xbf16, #tpu.memory_space<vmem>>, vector<16x128xbf16>
      tpu.vector_store %arg12[%c0_47, %c0_48], %54 {strides = array<i32>} : memref<16x256xbf16, #tpu.memory_space<vmem>>, vector<16x128xbf16>,
    } else {
    }
    %c0_3 = arith.constant 0 : index
    %c128 = arith.constant 128 : index
    %5 = vector.load %arg11[%c0_3, %c128] : memref<4x256xbf16, #tpu.memory_space<vmem>>, vector<4x128xbf16>
    tpu.vector_store %arg11[%c0_3, %c128], %1 {strides = array<i32>} : memref<4x256xbf16, #tpu.memory_space<vmem>>, vector<4x128xbf16>,
    %c0_4 = arith.constant 0 : index
    %c0_5 = arith.constant 0 : index
    %6 = vector.load %arg3[%c0_4, %c0_5] : memref<32x4xbf16, #tpu.memory_space<vmem>>, vector<32x4xbf16>
    %cst = arith.constant dense<0.000000e+00> : vector<32x128xf32>
    %7 = tpu.matmul %6, %1, %cst {dimension_numbers = #tpu.dot_dimension_numbers<[1], [0], [0], [1], [0, 0, 1, 1], [], []>} : vector<32x4xbf16>, vector<4x128xbf16>, vector<32x128xf32> -> vector<32x128xf32>
    %8 = vector.extract_strided_slice %7 {offsets = [0, 0], sizes = [16, 128], strides = [1, 1]} : vector<32x128xf32> to vector<16x128xf32>
    %c0_6 = arith.constant 0 : index
    %c0_7 = arith.constant 0 : index
    %9 = vector.load %arg7[%c0_6, %c0_7] : memref<32x4xbf16, #tpu.memory_space<vmem>>, vector<16x4xbf16>
    %c0_8 = arith.constant 0 : index
    %c124 = arith.constant 124 : index
    %10 = vector.load %arg11[%c0_8, %c124] : memref<4x256xbf16, #tpu.memory_space<vmem>>, vector<4x128xbf16>
    %cst_9 = arith.constant dense<0.000000e+00> : vector<16x128xf32>
    %11 = tpu.matmul %9, %10, %cst_9 {dimension_numbers = #tpu.dot_dimension_numbers<[1], [0], [0], [1], [0, 0, 1, 1], [], []>} : vector<16x4xbf16>, vector<4x128xbf16>, vector<16x128xf32> -> vector<16x128xf32>
    %12 = arith.addf %8, %11 : vector<16x128xf32>
    %c16 = arith.constant 16 : index
    %c0_10 = arith.constant 0 : index
    %13 = vector.load %arg7[%c16, %c0_10] : memref<32x4xbf16, #tpu.memory_space<vmem>>, vector<16x4xbf16>
    %c0_11 = arith.constant 0 : index
    %c126 = arith.constant 126 : index
    %14 = vector.load %arg11[%c0_11, %c126] : memref<4x256xbf16, #tpu.memory_space<vmem>>, vector<4x128xbf16>
    %cst_12 = arith.constant dense<0.000000e+00> : vector<16x128xf32>
    %15 = tpu.matmul %13, %14, %cst_12 {dimension_numbers = #tpu.dot_dimension_numbers<[1], [0], [0], [1], [0, 0, 1, 1], [], []>} : vector<16x4xbf16>, vector<4x128xbf16>, vector<16x128xf32> -> vector<16x128xf32>
    %16 = arith.addf %12, %15 : vector<16x128xf32>
    %c0_13 = arith.constant 0 : index
    %c0_14 = arith.constant 0 : index
    %17 = vector.load %arg4[%c0_13, %c0_14] : memref<16x1xf32, #tpu.memory_space<vmem>>, vector<16x1xf32>
    %18 = vector.broadcast %17 : vector<16x1xf32> to vector<16x128xf32>
    %19 = arith.addf %16, %18 : vector<16x128xf32>
    %cst_15 = arith.constant 0.000000e+00 : f32
    %20 = vector.broadcast %cst_15 : f32 to vector<16x128xf32>
    %21 = arith.maximumf %19, %20 : vector<16x128xf32>
    %22 = arith.truncf %21 : vector<16x128xf32> to vector<16x128xbf16>
    %c0_16 = arith.constant 0 : index
    %c128_17 = arith.constant 128 : index
    %23 = vector.load %arg12[%c0_16, %c128_17] : memref<16x256xbf16, #tpu.memory_space<vmem>>, vector<16x128xbf16>
    tpu.vector_store %arg12[%c0_16, %c128_17], %22 {strides = array<i32>} : memref<16x256xbf16, #tpu.memory_space<vmem>>, vector<16x128xbf16>,
    %c0_18 = arith.constant 0 : index
    %c0_19 = arith.constant 0 : index
    %24 = vector.load %arg5[%c0_18, %c0_19] : memref<16x16xbf16, #tpu.memory_space<vmem>>, vector<16x16xbf16>
    %cst_20 = arith.constant dense<0.000000e+00> : vector<16x128xf32>
    %25 = tpu.matmul %24, %22, %cst_20 {dimension_numbers = #tpu.dot_dimension_numbers<[1], [0], [0], [1], [0, 0, 1, 1], [], []>} : vector<16x16xbf16>, vector<16x128xbf16>, vector<16x128xf32> -> vector<16x128xf32>
    %c0_21 = arith.constant 0 : index
    %c0_22 = arith.constant 0 : index
    %26 = vector.load %arg8[%c0_21, %c0_22] : memref<32x16xbf16, #tpu.memory_space<vmem>>, vector<16x16xbf16>
    %c0_23 = arith.constant 0 : index
    %c124_24 = arith.constant 124 : index
    %27 = vector.load %arg12[%c0_23, %c124_24] : memref<16x256xbf16, #tpu.memory_space<vmem>>, vector<16x128xbf16>
    %cst_25 = arith.constant dense<0.000000e+00> : vector<16x128xf32>
    %28 = tpu.matmul %26, %27, %cst_25 {dimension_numbers = #tpu.dot_dimension_numbers<[1], [0], [0], [1], [0, 0, 1, 1], [], []>} : vector<16x16xbf16>, vector<16x128xbf16>, vector<16x128xf32> -> vector<16x128xf32>
    %29 = arith.addf %25, %28 : vector<16x128xf32>
    %c16_26 = arith.constant 16 : index
    %c0_27 = arith.constant 0 : index
    %30 = vector.load %arg8[%c16_26, %c0_27] : memref<32x16xbf16, #tpu.memory_space<vmem>>, vector<16x16xbf16>
    %c0_28 = arith.constant 0 : index
    %c126_29 = arith.constant 126 : index
    %31 = vector.load %arg12[%c0_28, %c126_29] : memref<16x256xbf16, #tpu.memory_space<vmem>>, vector<16x128xbf16>
    %cst_30 = arith.constant dense<0.000000e+00> : vector<16x128xf32>
    %32 = tpu.matmul %30, %31, %cst_30 {dimension_numbers = #tpu.dot_dimension_numbers<[1], [0], [0], [1], [0, 0, 1, 1], [], []>} : vector<16x16xbf16>, vector<16x128xbf16>, vector<16x128xf32> -> vector<16x128xf32>
    %33 = arith.addf %29, %32 : vector<16x128xf32>
    %c0_31 = arith.constant 0 : index
    %c0_32 = arith.constant 0 : index
    %34 = vector.load %arg6[%c0_31, %c0_32] : memref<16x1xf32, #tpu.memory_space<vmem>>, vector<16x1xf32>
    %35 = vector.broadcast %34 : vector<16x1xf32> to vector<16x128xf32>
    %36 = arith.addf %33, %35 : vector<16x128xf32>
    %cst_33 = arith.constant 0.000000e+00 : f32
    %37 = vector.broadcast %cst_33 : f32 to vector<16x128xf32>
    %38 = arith.maximumf %36, %37 : vector<16x128xf32>
    %39 = vector.extract_strided_slice %7 {offsets = [16, 0], sizes = [16, 128], strides = [1, 1]} : vector<32x128xf32> to vector<16x128xf32>
    %c0_34 = arith.constant 0 : index
    %c0_35 = arith.constant 0 : index
    %40 = vector.load %arg9[%c0_34, %c0_35] : memref<16x1xf32, #tpu.memory_space<vmem>>, vector<16x1xf32>
    %41 = vector.broadcast %40 : vector<16x1xf32> to vector<16x128xf32>
    %42 = arith.addf %39, %41 : vector<16x128xf32>
    %43 = arith.addf %38, %42 : vector<16x128xf32>
    %44 = vector.extract_strided_slice %43 {offsets = [0, 0], sizes = [8, 128], strides = [1, 1]} : vector<16x128xf32> to vector<8x128xf32>
    %c0_36 = arith.constant 0 : index
    %c0_37 = arith.constant 0 : index
    %c0_38 = arith.constant 0 : index
    %45 = vector.load %arg10[%c0_36, %c0_37, %c0_38] : memref<1x8x128xf32, #tpu.memory_space<vmem>>, vector<1x8x128xf32>
    %46 = vector.shape_cast %45 : vector<1x8x128xf32> to vector<8x128xf32>
    %47 = vector.shape_cast %44 : vector<8x128xf32> to vector<1x8x128xf32>
    tpu.vector_store %arg10[%c0_36, %c0_37, %c0_38], %47 {strides = array<i32>} : memref<1x8x128xf32, #tpu.memory_space<vmem>>, vector<1x8x128xf32>,
    %48 = vector.extract_strided_slice %1 {offsets = [0, 124], sizes = [4, 4], strides = [1, 1]} : vector<4x128xbf16> to vector<4x4xbf16>
    %c0_39 = arith.constant 0 : index
    %c124_40 = arith.constant 124 : index
    %49 = vector.load %arg11[%c0_39, %c124_40] : memref<4x256xbf16, #tpu.memory_space<vmem>>, vector<4x4xbf16>
    tpu.vector_store %arg11[%c0_39, %c124_40], %48 {strides = array<i32>} : memref<4x256xbf16, #tpu.memory_space<vmem>>, vector<4x4xbf16>,
    %50 = vector.extract_strided_slice %22 {offsets = [0, 124], sizes = [16, 4], strides = [1, 1]} : vector<16x128xbf16> to vector<16x4xbf16>
    %c0_41 = arith.constant 0 : index
    %c124_42 = arith.constant 124 : index
    %51 = vector.load %arg12[%c0_41, %c124_42] : memref<16x256xbf16, #tpu.memory_space<vmem>>, vector<16x4xbf16>
    tpu.vector_store %arg12[%c0_41, %c124_42], %50 {strides = array<i32>} : memref<16x256xbf16, #tpu.memory_space<vmem>>, vector<16x4xbf16>,
    return
  }
  func.func @transform_0(%arg0: i32, %arg1: i32) -> (i32, i32, i32) {
    %c0_i32 = arith.constant 0 : i32
    %c0_i32_0 = arith.constant 0 : i32
    return %arg0, %c0_i32, %arg1 : i32, i32, i32
  }
  func.func @transform_1(%arg0: i32, %arg1: i32) -> (i32, i32) {
    %c0_i32 = arith.constant 0 : i32
    %c0_i32_0 = arith.constant 0 : i32
    %c0_i32_1 = arith.constant 0 : i32
    return %c0_i32, %c0_i32_0 : i32, i32
  }
  func.func @transform_2(%arg0: i32, %arg1: i32) -> (i32, i32) {
    %c0_i32 = arith.constant 0 : i32
    %c0_i32_0 = arith.constant 0 : i32
    %c0_i32_1 = arith.constant 0 : i32
    return %c0_i32, %c0_i32_0 : i32, i32
  }
  func.func @transform_3(%arg0: i32, %arg1: i32) -> (i32, i32) {
    %c0_i32 = arith.constant 0 : i32
    %c0_i32_0 = arith.constant 0 : i32
    %c0_i32_1 = arith.constant 0 : i32
    return %c0_i32, %c0_i32_0 : i32, i32
  }
  func.func @transform_4(%arg0: i32, %arg1: i32) -> (i32, i32) {
    %c0_i32 = arith.constant 0 : i32
    %c0_i32_0 = arith.constant 0 : i32
    %c0_i32_1 = arith.constant 0 : i32
    return %c0_i32, %c0_i32_0 : i32, i32
  }
  func.func @transform_5(%arg0: i32, %arg1: i32) -> (i32, i32) {
    %c0_i32 = arith.constant 0 : i32
    %c0_i32_0 = arith.constant 0 : i32
    %c0_i32_1 = arith.constant 0 : i32
    return %c0_i32, %c0_i32_0 : i32, i32
  }
  func.func @transform_6(%arg0: i32, %arg1: i32) -> (i32, i32) {
    %c0_i32 = arith.constant 0 : i32
    %c0_i32_0 = arith.constant 0 : i32
    %c0_i32_1 = arith.constant 0 : i32
    return %c0_i32, %c0_i32_0 : i32, i32
  }
  func.func @transform_7(%arg0: i32, %arg1: i32) -> (i32, i32) {
    %c0_i32 = arith.constant 0 : i32
    %c0_i32_0 = arith.constant 0 : i32
    %c0_i32_1 = arith.constant 0 : i32
    return %c0_i32, %c0_i32_0 : i32, i32
  }
  func.func @transform_8(%arg0: i32, %arg1: i32) -> (i32, i32, i32) {
    %c0_i32 = arith.constant 0 : i32
    %c0_i32_0 = arith.constant 0 : i32
    return %arg0, %c0_i32, %arg1 : i32, i32, i32
  }
}

</mosaic_0001>

<bundles_post_ra>
// kernel: tpu_custom_call.1
= control target key start
LH: loop header
LB: loop body
LE: loop exit
PB: predicated region body
PF: predicated region fallthrough
CT: control target
= control target key end

     0   :  { %13 = vsyncpa [#allocation5], 0  ;;  %s1308_s0 = inlined_call_operand.vmem [shape: bf16[2,4,128], index: 0, kind: input, shape index: {}]   ;;  %s1309_s1 = inlined_call_operand.vmem [shape: bf16[32,4], index: 1, kind: input, shape index: {}]   ;;  %s1310_s2 = inlined_call_operand.vmem [shape: f32[16,1], index: 2, kind: input, shape index: {}]   ;;  %s1311_s3 = inlined_call_operand.vmem [shape: bf16[16,16], index: 3, kind: input, shape index: {}]   ;;  %s1312_s4 = inlined_call_operand.vmem [shape: f32[16,1], index: 4, kind: input, shape index: {}]   ;;  %s1313_s5 = inlined_call_operand.vmem [shape: bf16[32,4], index: 5, kind: input, shape index: {}]   ;;  %s1314_s6 = inlined_call_operand.vmem [shape: bf16[32,16], index: 6, kind: input, shape index: {}]   ;;  %s1315_s7 = inlined_call_operand.vmem [shape: f32[16,1], index: 7, kind: input, shape index: {}]   ;;  %s1316_s8 = inlined_call_operand.hbm [shape: f32[2,8,128], index: 8, kind: output, shape index: {}]  }
   0x1   :  { %15 = vsyncpa [#allocation5 + $0x1], 0  ;;  %s1122_s27 = smov 0   ;;  %s1124_s28 = smov 0  }
   0x2   :  { %s1126_s29 = smov 0   ;;  %s1128_s30 = smov 0  }
   0x3   :  { %s1130_s9 = smov 0   ;;  %s1132_s10 = smov 0  }
   0x4 LB: > { %s845_s11 = sadd.s32 4294967295, %s1069_s10   ;;  %s846_s12 = sadd.s32 4294967294, %s1069_s10   ;;  %s1069_s10 = sphi %s1132_s10, %s21_s10   ;;  %s1065_s9 = sphi %s1130_s9, %s1323_s9   ;;  %s1061_s30 = sphi %s1128_s30, %s1322_s30   ;;  %s1057_s29 = sphi %s1126_s29, %s1321_s29   ;;  %s1053_s28 = sphi %s1124_s28, %s1320_s28   ;;  %s1049_s27 = sphi %s1122_s27, %s1319_s27  }
   0x5   : > { %s33_s13 = sadd.s32 1, %s1065_s9  ;;  %s217_s14 = sadd.s32 1, %s1057_s29 }
   0x6   : > { %p35_p0 = scmp.ge.s32.totalorder %s33_s13, 2  ;;  %p227_p1 = scmp.ne.s32.totalorder %s1057_s29, %s1053_s28 }
   0x7   : > { %p228_p2 = scmp.eq.s32.totalorder %s845_s11, 1  ;;  %p233_p3 = scmp.ne.s32.totalorder %s1053_s28, %s1049_s27 }
   0x8   : > { %s1325_s13 = smov (%p35_p0, %s33_s13), 0  ;;  %p234_p5 = scmp.eq.s32.totalorder %s846_s12, 1 }
   0x9   : > { %p1162_p4 = por %p228_p2, %p227_p1  ;;  %s212_s16 = ssub.s32 %s1065_s9, %s1325_s13 }
   0xa   : > { %p849_p6 = scmp.ge.s32.totalorder %s1069_s10, 1  ;;  %p215_p7 = scmp.eq.s32.totalorder %s212_s16, 0 }
   0xb   : > { %p1169_p8 = por %p234_p5, %p233_p3  ;;  %p283_p9 = scmp.lt.s32.totalorder %s1069_s10, 3 }
   0xc   : > { %s1175_s18 = scalar_select %p215_p7, %s1057_s29, %s217_s14  }
   0xd   : > { %p284_p10 = pnand %p849_p6, %p283_p9 }
   0xe   : > { %p319_p11 = scmp.lt.s32.totalorder (!%p284_p10), %s1061_s30, 1  ;;  %v984_v0 = vld [vmem:[%s1309_s1] sm:$0xff] (!%p284_p10)   ;;  %v1071_v1 = vmov (!%p284_p10), 0   ;;  %vm349_vm0 = vcmask (!%p284_p10), 31744   ;;  %vm356_vm1 = vcmask (!%p284_p10), 1041408   ;;  %v985_v4 = vld [vmem:[%s1309_s1 + $0x8] sm:$0xff] (!%p284_p10)  }
   0xf   : > { %287 = sbr.rel (%p284_p10) target bundleno = 744 (0x2e8), region = 52  ;;  %332 = vst [vmem:[#allocation2] sm:$0x3] (!%p284_p10), %v1071_v1  ;;  %983 = vset.pattern.permute.xlu1 (!%p284_p10), %v1071_v1  ;;  %982 = vset.pattern.permute.xlu0 (!%p284_p10), %v1071_v1  ;;  %v1072_v5 = vmov (!%p284_p10), 0.0   ;;  %vm1073_vm2 = vmmov (!%p284_p10), 0   ;;  %vm755_vm3 = vcmask (!%p284_p10), 1042400  }
  0x10   : > { %887 = vmatprep.mubr.msk.bf16.mxu0 (!%p284_p10), %vm349_vm0, %v984_v0  ;;  %891 = vmatprep.subr.bf16.mxu1 (!%p284_p10), %v1072_v5  ;;  %s1074_s12 = smov (!%p284_p10), 2   ;;  %s1075_s14 = smov (!%p284_p10), 4   ;;  %v553_v8 = vld [vmem:[%s1310_s2 + $0x8] sm:$0xff] (!%p284_p10)  ;;  %v552_v9 = vld [vmem:[%s1310_s2] sm:$0xff] (!%p284_p10)  ;;  %vm501_vm4 = vcmask (!%p284_p10), 15360   ;;  %vm589_vm5 = vcmask (!%p284_p10), 130048  }
  0x11   : > { %893 = vmatprep.mubr.msk.bf16.mxu1 (!%p284_p10), %vm1073_vm2, %v1072_v5  ;;  %v738_v10 = vld [vmem:[%s1312_s4] sm:$0xff] (!%p284_p10)  ;;  %v987_v20 = vld [vmem:[%s1313_s5 + $0x8] sm:$0xff] (!%p284_p10)   ;;  %s316_s24 = sand.u32 (!%p284_p10), 1, %s1053_s28   ;;  %s869_s26 = sshll.u32 (!%p284_p10), %s1061_s30, 7 }
  0x12   : > { %v986_v19 = vld [vmem:[%s1313_s5] sm:$0xff] (!%p284_p10)   ;;  %v990_v53 = vld [vmem:[%s1314_s6 + $0x8] sm:$0xff] (!%p284_p10)  }
  0x13   : > { %v989_v44 = vld [vmem:[%s1311_s3] sm:$0xff] (!%p284_p10)  }
  0x14   : > { %v746_v45 = vld [vmem:[%s1315_s7] sm:$0xff] (!%p284_p10) }
  0x15   : > { %v988_v49 = vld [vmem:[%s1314_s6] sm:$0xff] (!%p284_p10)  }
  0x16   : > { %s320_s21 = scalar_select %p319_p11, %s1061_s30, 1 }
  0x17   : > { %s1076_s30 = smov [#allocation4]  }
  0x18   : > { %s851_s22 = sshll.u32 %s320_s21, 1  ;;  %s1261_s21 = scalar_lea.hbm %s1316_s8, %s869_s26 }
  0x19   : > { %s325_s25 = scalar_lea.vmem %s1308_s0, %s851_s22  ;;  %s760_s22 = scalar_lea.sflag [#allocation5], %s316_s24 }
  0x1a   : > { %v327_v2 = vld [vmem:[%s325_s25] sm:$0x3]  ;;  %s850_s25 = sshll.u32 %s316_s24, 3 }
  0x1b   : > { %334 = vst [vmem:[#allocation2 + $0x2] sm:$0x3] %v327_v2  ;;  %921 = vmatprep.subr.msk.bf16.mxu0 %vm356_vm1, %v327_v2  ;;  %v358_v3 = vsel %vm356_vm1, %v327_v2, 0  ;;  %s318_s11 = scalar_lea.vmem [#allocation4], %s850_s25 }
  0x1c   : > { %886 = vmatpush3.bf16.msra.mxu0 %v358_v3  ;;  %s774_s16 = sshll.u32 %s318_s11, 4  ;;  %s1263_s16 = int_to_ptr.vmem [resolvable:$true] %s774_s16 }
  0x1d   : > { %897 = vmatprep.subr.bf16.mxu0 %v1072_v5  ;;  %s991_s23 = scalar_lea.vmem %s1263_s16, 128 }
  0x1e   : > { %p992_p12 = scmp.ne.s32.totalorder %s1263_s16, %s991_s23 }
  0x1f   : > { %888 = vmatmul.mubr.msk.bf16.vlgmr.msra.gmra.mrb[0].mxu0 %vm349_vm0, %v985_v4 }
  0x20   : > { %899 = vmatprep.mubr.msk.bf16.mxu0 %vm1073_vm2, %v1072_v5  ;;  %p993_p13 = pnand %p992_p12, %p1162_p4 }
  0x22   : > { %v860_v6 = vld.sshfl [vmem:[#allocation2] sm:$0x33 pattern:$0x76325410]  ;;  %p994_p0 = pneg %p993_p13 }
  0x23   : > { %497 = vrot.lane.b32.xlu1 %v860_v6, %s1074_s12  ;;  %425 = vrot.lane.b32.xlu0 %v860_v6, %s1075_s14  ;;  %756 = vst.msk [vmem:[#allocation2] sm:$0x3] %vm755_vm3, %v327_v2  ;;  %v496_v7 = vcombine.high %v860_v6, %v860_v6 }
  0x27   : > { %499 = vrot.lane.b32.xlu1 %v496_v7, %s1074_s12  ;;  %427 = vrot.lane.b32.xlu0 %v496_v7, %s1075_s14 }
  0x2b   : > { %561 = vperm.xlu1 %983, %v553_v8   ;;  %556 = vperm.xlu0 %982, %v552_v9  }
  0x2f   : > { %583 = vrot.lane.b32.xlu1 %v1071_v1, %s1075_s14 }
  0x33   : > { %688 = vrot.lane.b32.xlu1 %v1071_v1, %s1074_s12 }
  0x37   : > { %741 = vperm.xlu1 %983, %v738_v10  }
  0x95   : > { %v498_v11 = vpop.permute.xlu1 %497  ;;  %v426_v12 = vpop.permute.xlu0 %425 }
  0x99   : > { %v500_v13 = vpop.permute.xlu1 %499  ;;  %v428_v14 = vpop.permute.xlu0 %427 }
  0x9a   : > { %v502_v15 = vsel %vm501_vm4, %v498_v11, %v500_v13  ;;  %v430_v16 = vsel %vm349_vm0, %v426_v12, %v428_v14 }
  0x9b   : > { %v507_v17 = vsel %vm356_vm1, %v502_v15, 0  ;;  %v435_v18 = vsel %vm356_vm1, %v430_v16, 0 }
  0x9c   : > { %892 = vmatpush3.bf16.msra.mxu1 %v435_v18  ;;  %898 = vmatpush3.bf16.msra.mxu0 %v507_v17 }
  0x9d   : > { %909 = vmatprep.subr.bf16.mxu0 %v1072_v5  ;;  %903 = vmatprep.subr.bf16.mxu1 %v1072_v5 }
  0x9f   : > { %894 = vmatmul.mubr.msk.bf16.vlgmr.msra.gmra.mrb[0].mxu1 %vm349_vm0, %v986_v19  ;;  %900 = vmatmul.mubr.msk.bf16.vlgmr.msra.gmra.mrb[4].mxu0 %vm349_vm0, %v987_v20 }
  0xa0   : > { %905 = vmatprep.mubr.msk.bf16.mxu1 %vm1073_vm2, %v1072_v5  ;;  %911 = vmatprep.mubr.msk.bf16.mxu0 %vm1073_vm2, %v1072_v5 }
  0xaa   : > { %v557_v25 = vpop.permute.xlu0 %556  ;;  %v562_v39 = vpop.permute.xlu1 %561 }
  0xae   : > { %v584_v46 = vpop.permute.xlu1 %583 }
  0xb2   : > { %v689_v50 = vpop.permute.xlu1 %688 }
  0xb6   : > { %v742_v0 = vpop.permute.xlu1 %741 }
  0xf2   : > { %v1231_v21 = vpop.f32.mrb[0].mxu0 }
  0xf3   : > { %v394_v22 = vpop.f32.mrb[1].mxu0 }
  0xf4   : > { %v890_v23 = vpop.f32.mrb[2].mxu0 }
  0xf5   : > { %v397_v24 = vpop.f32.mrb[3].mxu0 }
 0x172   : > { %v471_v26 = vpop.f32.mrb[0].mxu1  ;;  %v543_v27 = vpop.f32.mrb[4].mxu0 }
 0x173   : > { %v478_v28 = vadd.f32 %v471_v26, %v394_v22  ;;  %v895_v29 = vpop.f32.mrb[1].mxu1  ;;  %v901_v30 = vpop.f32.mrb[5].mxu0 }
 0x174   : > { %v546_v31 = vpop.f32.mrb[6].mxu0  ;;  %v474_v32 = vpop.f32.mrb[2].mxu1 }
 0x175   : > { %v550_v33 = vadd.f32 %v543_v27, %v478_v28  ;;  %v479_v34 = vadd.f32 %v474_v32, %v397_v24  ;;  %v896_v35 = vpop.f32.mrb[3].mxu1  ;;  %v902_v36 = vpop.f32.mrb[7].mxu0 }
 0x177   : > { %v551_v37 = vadd.f32 %v546_v31, %v479_v34  ;;  %v564_v38 = vadd.f32 %v557_v25, %v550_v33 }
 0x179   : > { %v565_v40 = vadd.f32 %v562_v39, %v551_v37  ;;  %v566_v42 = vmax.f32 %v564_v38, 0.0 }
 0x17b   : > { %v567_v41 = vmax.f32 %v565_v40, 0.0 }
 0x17d   : > { %v568_v43 = vpack.c.bf16 %v567_v41, %v566_v42 }
 0x17f   : > { %910 = vmatpush3.bf16.msra.mxu0 %v568_v43  ;;  %585 = vrot.lane.b32.xlu0 %v568_v43, %s1075_s14 }
 0x182   : > { %912 = vmatmul.mubr.msk.bf16.vlgmr.msra.gmra.mrb[8].mxu0 %vm589_vm5, %v989_v44 }
 0x183   : > { %690 = vrot.lane.b32.xlu0 %v568_v43, %s1074_s12  ;;  %s995_s12 = sshll.u32 %s1076_s30, 4  ;;  %s996_s12 = int_to_ptr.vmem [resolvable:$false] %s995_s12 }
 0x184   : > { %s997_s14 = scalar_lea.vmem %s996_s12, 256  ;;  %p998_p1 = scmp.lt.s32.totalorder %s1263_s16, %s996_s12 }
 0x185   : > { %p999_p2 = scmp.lt.s32.totalorder %s997_s14, %s991_s23 }
 0x187   : > { %749 = vperm.xlu0 %982, %v746_v45   ;;  %p1000_p3 = por %p999_p2, %p998_p1 }
 0x189   : > { %p1001_p5 = pnand %p1000_p3, %p994_p0 }
 0x1f1   : > { %v586_v47 = vpop.permute.xlu0 %585 }
 0x1f2   : > { %v587_v48 = vsel %vm349_vm0, %v584_v46, %v586_v47 }
 0x1f3   : > { %904 = vmatpush3.bf16.msra.mxu1 %v587_v48 }
 0x1f4   : > { %915 = vmatprep.subr.bf16.mxu1 %v1072_v5 }
 0x1f5   : > { %v691_v51 = vpop.permute.xlu0 %690 }
 0x1f6   : > { %v692_v52 = vsel %vm501_vm4, %v689_v50, %v691_v51  ;;  %906 = vmatmul.mubr.msk.bf16.vlgmr.msra.gmra.mrb[4].mxu1 %vm589_vm5, %v988_v49 }
 0x1f7   : > { %916 = vmatpush3.bf16.msra.mxu1 %v692_v52  ;;  %917 = vmatprep.mubr.msk.bf16.mxu1 %vm1073_vm2, %v1072_v5 }
 0x1fe   : > { %918 = vmatmul.mubr.msk.bf16.vlgmr.msra.gmra.mrb[8].mxu1 %vm589_vm5, %v990_v53 }
 0x206   : > { %v750_v3 = vpop.permute.xlu0 %749 }
 0x207   : > { %v752_v7 = vadd.f32 %v1231_v21, %v750_v3 }
 0x255   : > { %v675_v54 = vpop.f32.mrb[8].mxu0 }
 0x256   : > { %v913_v55 = vpop.f32.mrb[9].mxu0 }
 0x257   : > { %v678_v56 = vpop.f32.mrb[10].mxu0 }
 0x258   : > { %v914_v57 = vpop.f32.mrb[11].mxu0 }
 0x2c9   : > { %v627_v58 = vpop.f32.mrb[4].mxu1 }
 0x2ca   : > { %v907_v59 = vpop.f32.mrb[5].mxu1  ;;  %v676_v60 = vadd.f32 %v675_v54, %v627_v58 }
 0x2cb   : > { %v630_v61 = vpop.f32.mrb[6].mxu1 }
 0x2cc   : > { %v908_v62 = vpop.f32.mrb[7].mxu1 }
 0x2d1   : > { %v731_v63 = vpop.f32.mrb[8].mxu1 }
 0x2d2   : > { %v737_v1 = vadd.f32 %v731_v63, %v676_v60  ;;  %v919_v2 = vpop.f32.mrb[9].mxu1 }
 0x2d3   : > { %v734_v4 = vpop.f32.mrb[10].mxu1 }
 0x2d4   : > { %v744_v5 = vadd.f32 %v742_v0, %v737_v1  ;;  %v920_v6 = vpop.f32.mrb[11].mxu1 }
 0x2d6   : > { %v745_v8 = vmax.f32 %v744_v5, 0.0 }
 0x2d8   : > { %v753_v9 = vadd.f32 %v752_v7, %v745_v8 }
 0x2da   : > { %754 = vst [vmem:[%s318_s11] sm:$0xff] %v753_v9 }
 0x2db   : > { %1004 = shalt.err (!%p1001_p5)
}
 0x2dc   : > { %s1005_s24 = scalar_lea.hbm %s1261_s21, 128  ;;  %s1009_s11 = scalar_lea.hbm %s1316_s8, 256 }
 0x2dd   : > { %p1006_p6 = scmp.ne.s32.totalorder %s1261_s21, %s1005_s24  ;;  %p1010_p10 = scmp.lt.u32.totalorder %s1261_s21, %s1316_s8 }
 0x2de   : > { %p1011_p11 = scmp.lt.u32.totalorder %s1009_s11, %s1005_s24  ;;  %p1013_p13 = scmp.lt.u32.totalorder %s1005_s24, %s1261_s21 }
 0x2df   : > { %p1007_p7 = pnand %p1006_p6, %p1162_p4 }
 0x2e0   : > { %p1012_p12 = por %p1011_p11, %p1010_p10 }
 0x2e1   : > { %p1008_p9 = pneg %p1007_p7 }
 0x2e2   : > { %p1014_p0 = por %p1013_p13, %p1012_p12 }
 0x2e4   : > { %p1015_p1 = pnand %p1014_p0, %p1008_p9 }
 0x2e6   : > { %1018 = shalt.err (!%p1015_p1)
}
 0x2e7   : > { %922 = dma.vmem_to_hbm [thread:$0]  (%p1162_p4), %s1263_s16, 128, %s1261_s21, %s760_s22  }
 0x2e8 PF: > { %p928_p2 = scmp.ge.s32.totalorder %s1069_s10, 2  ;;  %s786_s23 = sand.u32 1, %s1049_s27  }
 0x2e9   : > { %s787_s30 = scalar_lea.sflag [#allocation5], %s786_s23 }
 0x2ea   : > { %p925_p3 = pnand %p928_p2, %p1169_p8 }
 0x2ec   : > { %1044 = dma.done.wait (!%p925_p3), %s787_s30, 128  }
 0x2ed   : > { %1046 = vsyncadd (!%p925_p3), %s787_s30, 4294967168  ;;  %s21_s10 = sadd.s32 1, %s1069_s10   ;;  %s1319_s27 = smov %s1053_s28 }
 0x2ee   : > { %p18_p5 = scmp.ge.s32.totalorder %s21_s10, 4   ;;  %s1320_s28 = smov %s1057_s29 }
 0x2ef   : > { %s1321_s29 = smov %s1175_s18  ;;  %s1322_s30 = smov %s1065_s9 }
 0x2f0   : > { %s1323_s9 = smov %s1325_s13  ;;  %20 = sbr.rel (!%p18_p5) target bundleno = 4 (0x4), region = 91 }
 0x2f7   :  { %792 = vsyncpa [#allocation5], 1 }
 0x2f8   :  { %794 = vsyncpa [#allocation5 + $0x1], 1 }

</bundles_post_ra>
